<compile_context>
chip_gen: v7x
topology: tpu7x:2x2x1
jax: 0.10.0
libtpu: 0.0.40
codegen_flags: <defaults>
</compile_context>

<pallas_src>
import jax
import jax.numpy as jnp
from jax.experimental import pallas as pl
from jax.experimental.pallas import tpu as pltpu

LANES = 128                                      # one full vreg lane width
IN_FEATURES = 10
OUT_FEATURES = 10
DIMS = [(10, 20), (20, 40), (40, 30), (30, 10)]  # (in, out) per linear layer
NEG_BIG = -1e30                                  # finite "mask" for padded logits


def mlp_kernel(x_ref, w0_ref, wp_ref, bp_ref, out_ref):
    x = x_ref[...]                                           # (tb, 10)

    # lin0 + ReLU: (tb,10) x (10,128) -> (tb,128); padded lanes stay exactly 0.
    h = jnp.dot(x, w0_ref[...], preferred_element_type=jnp.float32) + bp_ref[0:1, :]
    h = jnp.maximum(h, 0.0)
    # lin1 + ReLU
    h = jnp.dot(h, wp_ref[0], preferred_element_type=jnp.float32) + bp_ref[1:2, :]
    h = jnp.maximum(h, 0.0)
    # lin2 + ReLU
    h = jnp.dot(h, wp_ref[1], preferred_element_type=jnp.float32) + bp_ref[2:3, :]
    h = jnp.maximum(h, 0.0)
    # lin3: padded output lanes get bias -1e30 -> self-exclude from the softmax.
    logits = jnp.dot(h, wp_ref[2], preferred_element_type=jnp.float32) + bp_ref[3:4, :]

    # LogSoftmax(dim=-1): padded lanes are ~-1e30 so they never win the max and
    # exp(z) underflows to exactly 0 there -> no iota / where needed.
    m = jnp.max(logits, axis=-1, keepdims=True)
    z = logits - m
    lse = jnp.log(jnp.sum(jnp.exp(z), axis=-1, keepdims=True))
    out_ref[...] = (z - lse)[:, :OUT_FEATURES].astype(out_ref.dtype)


def _round_up(v, m):
    return (v + m - 1) // m * m


def pad_params(params):
    """Pad/pack parameters ONCE (reuse across forward calls).

    params: list of 4 (W_t, b) with W_t shape (in, out), b shape (out,) or (1, out).
    Returns (w0_pad (10,128), w_pack (3,128,128), b_pack (4,128))."""
    assert len(params) == 4
    (w0_t, b0), rest = params[0], params[1:]
    d_in0, d_out0 = DIMS[0]
    w0_pad = jnp.zeros((d_in0, LANES), jnp.float32).at[:, :d_out0].set(
        jnp.asarray(w0_t, jnp.float32))

    w_pack = jnp.zeros((3, LANES, LANES), jnp.float32)
    for k, ((d_in, d_out), (w_t, _)) in enumerate(zip(DIMS[1:], rest)):
        w_pack = w_pack.at[k, :d_in, :d_out].set(jnp.asarray(w_t, jnp.float32))

    b_pack = jnp.zeros((4, LANES), jnp.float32)
    for k, ((_, d_out), (_, b)) in enumerate(zip(DIMS, params)):
        b_pack = b_pack.at[k, :d_out].set(
            jnp.reshape(jnp.asarray(b, jnp.float32), (d_out,)))
    # Finite large-negative padding on the last layer's invalid lanes (not -inf,
    # to avoid inf-inf -> NaN in z - lse); those lanes are never stored anyway.
    b_pack = b_pack.at[3, OUT_FEATURES:].set(NEG_BIG)
    return w0_pad, w_pack, b_pack


def mlp_forward(x, padded_params, *, block_rows=512):
    """x: (batch, 10) float32.  padded_params: output of pad_params().

    block_rows: 512-1024 on single-TC chips (v5e/v6e); 128-256 on v7x so each
    of the 2 TensorCores gets >=2 grid steps of DMA/compute overlap."""
    w0_pad, w_pack, b_pack = padded_params
    batch, in_features = x.shape
    assert in_features == IN_FEATURES

    # Batch tile: multiple of 8 (f32 sublanes), capped by the (padded) batch.
    tb = min(block_rows, _round_up(batch, 8))
    batch_pad = _round_up(batch, tb)
    grid = (pl.cdiv(batch_pad, tb),)

    # Only the batch dim is padded; feature dim stays at its true width (10).
    if batch_pad != batch:
        x_in = jnp.zeros((batch_pad, IN_FEATURES), jnp.float32).at[:batch].set(x)
    else:
        x_in = x.astype(jnp.float32)

    x_spec = pl.BlockSpec((tb, IN_FEATURES), lambda i: (i, 0))
    w0_spec = pl.BlockSpec((IN_FEATURES, LANES), lambda i: (0, 0))      # resident
    wp_spec = pl.BlockSpec((3, LANES, LANES), lambda i: (0, 0, 0))      # resident
    bp_spec = pl.BlockSpec((4, LANES), lambda i: (0, 0))                # resident
    out_spec = pl.BlockSpec((tb, OUT_FEATURES), lambda i: (i, 0))

    out_pad = pl.pallas_call(
        mlp_kernel,
        out_shape=jax.ShapeDtypeStruct((batch_pad, OUT_FEATURES), jnp.float32),
        grid=grid,
        in_specs=[x_spec, w0_spec, wp_spec, bp_spec],
        out_specs=out_spec,
        compiler_params=pltpu.CompilerParams(
            dimension_semantics=("parallel",)),
    )(x_in, w0_pad, w_pack, b_pack)

    return out_pad[:batch]


def init_params(key):
    """Deterministic init matching nn.Linear: (out,in) weight + (out,) bias,
    stored as (in,out) / (out,) for the kernel (x @ W.T + b == x @ W_t + b)."""
    params = []
    for (d_in, d_out) in DIMS:
        key, kw, kb = jax.random.split(key, 3)
        bound = 1.0 / jnp.sqrt(d_in)
        w = jax.random.uniform(kw, (d_out, d_in), jnp.float32, -bound, bound)
        b = jax.random.uniform(kb, (d_out,), jnp.float32, -bound, bound)
        params.append((w.T, b))
    return params


def reference_forward(x, params):
    h = x
    for i, (w_t, b) in enumerate(params):
        h = h @ w_t + jnp.reshape(b, (1, -1))
        if i < 3:
            h = jnp.maximum(h, 0.0)
    return jax.nn.log_softmax(h, axis=-1)


if __name__ == "__main__":
    key = jax.random.PRNGKey(0)
    key, kx = jax.random.split(key)
    batch = 256
    x = jax.random.normal(kx, (batch, IN_FEATURES), jnp.float32)

    params = init_params(key)
    padded = pad_params(params)          # padded/packed once, reused per call

    out = mlp_forward(x, padded, block_rows=128)   # grid=(2,)
    out = jax.block_until_ready(out)

    ref = reference_forward(x, params)
    assert out.shape == (batch, OUT_FEATURES)
    assert jnp.allclose(out, ref, atol=1e-5, rtol=1e-5), "mismatch vs reference"

    print("KERNEL_OK")
</pallas_src>

<mosaic_0001>
module attributes {stable_mosaic.version = 11 : i64} {
  func.func @mlp_kernel(%arg0: i32, %arg1: memref<128x10xf32, #tpu.memory_space<vmem>>, %arg2: memref<10x128xf32, #tpu.memory_space<vmem>>, %arg3: memref<3x128x128xf32, #tpu.memory_space<vmem>>, %arg4: memref<4x128xf32, #tpu.memory_space<vmem>>, %arg5: memref<128x10xf32, #tpu.memory_space<vmem>>) attributes {dimension_semantics = [#tpu.dimension_semantics<parallel>], iteration_bounds = array<i64: 2>, scalar_prefetch = 0 : i64, scratch_operands = 0 : i64, tpu.core_type = #tpu.core_type<tc>, window_params = [{transform_indices = @transform_0, window_bounds = array<i64: 128, 10>}, {pipeline_mode = #tpu.pipeline_mode<synchronous>, transform_indices = @transform_1, window_bounds = array<i64: 10, 128>}, {pipeline_mode = #tpu.pipeline_mode<synchronous>, transform_indices = @transform_2, window_bounds = array<i64: 3, 128, 128>}, {pipeline_mode = #tpu.pipeline_mode<synchronous>, transform_indices = @transform_3, window_bounds = array<i64: 4, 128>}, {transform_indices = @transform_4, window_bounds = array<i64: 128, 10>}]} {
    %c0 = arith.constant 0 : index
    %c0_0 = arith.constant 0 : index
    %0 = vector.load %arg1[%c0, %c0_0] : memref<128x10xf32, #tpu.memory_space<vmem>>, vector<128x10xf32>
    %c0_1 = arith.constant 0 : index
    %c0_2 = arith.constant 0 : index
    %1 = vector.load %arg2[%c0_1, %c0_2] : memref<10x128xf32, #tpu.memory_space<vmem>>, vector<10x128xf32>
    %cst = arith.constant dense<0.000000e+00> : vector<128x128xf32>
    %2 = tpu.matmul %0, %1, %cst {dimension_numbers = #tpu.dot_dimension_numbers<[1], [0], [0], [1], [0, 0, 1, 1], [], []>} : vector<128x10xf32>, vector<10x128xf32>, vector<128x128xf32> -> vector<128x128xf32>
    %c0_3 = arith.constant 0 : index
    %c0_4 = arith.constant 0 : index
    %3 = vector.load %arg4[%c0_3, %c0_4] : memref<4x128xf32, #tpu.memory_space<vmem>>, vector<1x128xf32>
    %4 = vector.broadcast %3 : vector<1x128xf32> to vector<128x128xf32>
    %5 = arith.addf %2, %4 : vector<128x128xf32>
    %cst_5 = arith.constant 0.000000e+00 : f32
    %6 = vector.broadcast %cst_5 : f32 to vector<128x128xf32>
    %7 = arith.maximumf %5, %6 : vector<128x128xf32>
    %c0_6 = arith.constant 0 : index
    %c0_7 = arith.constant 0 : index
    %c0_8 = arith.constant 0 : index
    %8 = vector.load %arg3[%c0_6, %c0_7, %c0_8] : memref<3x128x128xf32, #tpu.memory_space<vmem>>, vector<1x128x128xf32>
    %9 = vector.shape_cast %8 : vector<1x128x128xf32> to vector<128x128xf32>
    %cst_9 = arith.constant dense<0.000000e+00> : vector<128x128xf32>
    %10 = tpu.matmul %7, %9, %cst_9 {dimension_numbers = #tpu.dot_dimension_numbers<[1], [0], [0], [1], [0, 0, 1, 1], [], []>} : vector<128x128xf32>, vector<128x128xf32>, vector<128x128xf32> -> vector<128x128xf32>
    %c1 = arith.constant 1 : index
    %c0_10 = arith.constant 0 : index
    %11 = vector.load %arg4[%c1, %c0_10] : memref<4x128xf32, #tpu.memory_space<vmem>>, vector<1x128xf32>
    %12 = vector.broadcast %11 : vector<1x128xf32> to vector<128x128xf32>
    %13 = arith.addf %10, %12 : vector<128x128xf32>
    %cst_11 = arith.constant 0.000000e+00 : f32
    %14 = vector.broadcast %cst_11 : f32 to vector<128x128xf32>
    %15 = arith.maximumf %13, %14 : vector<128x128xf32>
    %c1_12 = arith.constant 1 : index
    %c0_13 = arith.constant 0 : index
    %c0_14 = arith.constant 0 : index
    %16 = vector.load %arg3[%c1_12, %c0_13, %c0_14] : memref<3x128x128xf32, #tpu.memory_space<vmem>>, vector<1x128x128xf32>
    %17 = vector.shape_cast %16 : vector<1x128x128xf32> to vector<128x128xf32>
    %cst_15 = arith.constant dense<0.000000e+00> : vector<128x128xf32>
    %18 = tpu.matmul %15, %17, %cst_15 {dimension_numbers = #tpu.dot_dimension_numbers<[1], [0], [0], [1], [0, 0, 1, 1], [], []>} : vector<128x128xf32>, vector<128x128xf32>, vector<128x128xf32> -> vector<128x128xf32>
    %c2 = arith.constant 2 : index
    %c0_16 = arith.constant 0 : index
    %19 = vector.load %arg4[%c2, %c0_16] : memref<4x128xf32, #tpu.memory_space<vmem>>, vector<1x128xf32>
    %20 = vector.broadcast %19 : vector<1x128xf32> to vector<128x128xf32>
    %21 = arith.addf %18, %20 : vector<128x128xf32>
    %cst_17 = arith.constant 0.000000e+00 : f32
    %22 = vector.broadcast %cst_17 : f32 to vector<128x128xf32>
    %23 = arith.maximumf %21, %22 : vector<128x128xf32>
    %c2_18 = arith.constant 2 : index
    %c0_19 = arith.constant 0 : index
    %c0_20 = arith.constant 0 : index
    %24 = vector.load %arg3[%c2_18, %c0_19, %c0_20] : memref<3x128x128xf32, #tpu.memory_space<vmem>>, vector<1x128x128xf32>
    %25 = vector.shape_cast %24 : vector<1x128x128xf32> to vector<128x128xf32>
    %cst_21 = arith.constant dense<0.000000e+00> : vector<128x128xf32>
    %26 = tpu.matmul %23, %25, %cst_21 {dimension_numbers = #tpu.dot_dimension_numbers<[1], [0], [0], [1], [0, 0, 1, 1], [], []>} : vector<128x128xf32>, vector<128x128xf32>, vector<128x128xf32> -> vector<128x128xf32>
    %c3 = arith.constant 3 : index
    %c0_22 = arith.constant 0 : index
    %27 = vector.load %arg4[%c3, %c0_22] : memref<4x128xf32, #tpu.memory_space<vmem>>, vector<1x128xf32>
    %28 = vector.broadcast %27 : vector<1x128xf32> to vector<128x128xf32>
    %29 = arith.addf %26, %28 : vector<128x128xf32>
    %cst_23 = arith.constant dense<0xFF800000> : vector<128xf32>
    %30 = vector.multi_reduction <maximumf>, %29, %cst_23 [1] : vector<128x128xf32> to vector<128xf32>
    %31 = vector.shape_cast %30 : vector<128xf32> to vector<128x1xf32>
    %32 = vector.broadcast %31 : vector<128x1xf32> to vector<128x128xf32>
    %33 = arith.subf %29, %32 : vector<128x128xf32>
    %34 = math.exp %33 : vector<128x128xf32>
    %cst_24 = arith.constant dense<0.000000e+00> : vector<128xf32>
    %35 = vector.multi_reduction <add>, %34, %cst_24 [1] : vector<128x128xf32> to vector<128xf32>
    %36 = vector.shape_cast %35 : vector<128xf32> to vector<128x1xf32>
    %37 = math.log %36 : vector<128x1xf32>
    %38 = vector.broadcast %37 : vector<128x1xf32> to vector<128x128xf32>
    %39 = arith.subf %33, %38 : vector<128x128xf32>
    %40 = vector.extract_strided_slice %39 {offsets = [0, 0], sizes = [128, 10], strides = [1, 1]} : vector<128x128xf32> to vector<128x10xf32>
    %c0_25 = arith.constant 0 : index
    %c0_26 = arith.constant 0 : index
    %41 = vector.load %arg5[%c0_25, %c0_26] : memref<128x10xf32, #tpu.memory_space<vmem>>, vector<128x10xf32>
    tpu.vector_store %arg5[%c0_25, %c0_26], %40 {strides = array<i32>} : memref<128x10xf32, #tpu.memory_space<vmem>>, vector<128x10xf32>,
    return
  }
  func.func @transform_0(%arg0: i32) -> (i32, i32) {
    %c0_i32 = arith.constant 0 : i32
    %c0_i32_0 = arith.constant 0 : i32
    return %arg0, %c0_i32 : i32, i32
  }
  func.func @transform_1(%arg0: i32) -> (i32, i32) {
    %c0_i32 = arith.constant 0 : i32
    %c0_i32_0 = arith.constant 0 : i32
    %c0_i32_1 = arith.constant 0 : i32
    return %c0_i32, %c0_i32_0 : i32, i32
  }
  func.func @transform_2(%arg0: i32) -> (i32, i32, i32) {
    %c0_i32 = arith.constant 0 : i32
    %c0_i32_0 = arith.constant 0 : i32
    %c0_i32_1 = arith.constant 0 : i32
    %c0_i32_2 = arith.constant 0 : i32
    return %c0_i32, %c0_i32_0, %c0_i32_1 : i32, i32, i32
  }
  func.func @transform_3(%arg0: i32) -> (i32, i32) {
    %c0_i32 = arith.constant 0 : i32
    %c0_i32_0 = arith.constant 0 : i32
    %c0_i32_1 = arith.constant 0 : i32
    return %c0_i32, %c0_i32_0 : i32, i32
  }
  func.func @transform_4(%arg0: i32) -> (i32, i32) {
    %c0_i32 = arith.constant 0 : i32
    %c0_i32_0 = arith.constant 0 : i32
    return %arg0, %c0_i32 : i32, i32
  }
}

</mosaic_0001>

<bundles_post_ra>
// kernel: tpu_custom_call.1
= control target key start
LH: loop header
LB: loop body
LE: loop exit
PB: predicated region body
PF: predicated region fallthrough
CT: control target
= control target key end

     0   :  { %9 = vsyncpa [#allocation3], 0  ;;  %s1846_s15 = smov 0   ;;  %s2120_s0 = inlined_call_operand.vmem [shape: f32[256,10], index: 0, kind: input, shape index: {}]   ;;  %s2121_s1 = inlined_call_operand.vmem [shape: f32[10,128], index: 1, kind: input, shape index: {}]   ;;  %s2122_s2 = inlined_call_operand.hbm [shape: f32[3,128,128], index: 2, kind: input, shape index: {}]   ;;  %s2123_s3 = inlined_call_operand.vmem [shape: f32[4,128], index: 3, kind: input, shape index: {}]   ;;  %s2124_s4 = inlined_call_operand.vmem [shape: f32[256,10], index: 4, kind: output, shape index: {}]  }
   0x1 LB: > { %s1229_s16 = sadd.s32 4294967295, %s1815_s15   ;;  %p1231_p0 = scmp.ge.s32.totalorder %s1815_s15, 1  ;;  %s1815_s15 = sphi %s1846_s15, %s15_s15  }
   0x2   : > { %p135_p1 = scmp.lt.s32.totalorder %s1815_s15, 3  ;;  %s1817_s17 = smov [#allocation2]  }
   0x3   : > { %s150_s18 = sshll.u32 %s1817_s17, 4  ;;  %p1860_p3 = scmp.eq.s32.totalorder %s1229_s16, 0  ;;  %s151_s18 = int_to_ptr.vmem [resolvable:$true] %s150_s18 }
   0x4   : > { %p1854_p2 = pnand %p1231_p0, %p135_p1  ;;  %s1777_s24 = scalar_lea.hbm %s2122_s2, 6144 }
   0x5   : > { %s2129_s20 = scalar_select %p1860_p3, 1, 0 }
   0x6   : > { %s2128_s19 = scalar_select %p1854_p2, 1, 0 }
   0x7   : > { %p1695_p4 = pneg %p1854_p2  ;;  %p1778_p6 = scmp.ne.s32.totalorder %s2122_s2, %s1777_s24 }
   0x8   : > { %p1784_p10 = scmp.lt.u32.totalorder %s1777_s24, %s2122_s2 }
   0x9   : > { %p1868_p5 = pnand %p1860_p3, %p1695_p4 }
   0xb   : > { %p1779_p7 = pneg %p1868_p5 }
   0xd   : > { %p1780_p8 = pnand %p1779_p7, %p1778_p6 }
   0xf   : > { %p1781_p9 = pneg %p1780_p8 }
  0x11   : > { %p1786_p11 = pnand %p1784_p10, %p1781_p9 }
  0x13   : > { %1789 = shalt.err (!%p1786_p11)
}
  0x14   : > { %s1790_s29 = scalar_lea.vmem %s151_s18, 6144  ;;  %p1798_p1 = scmp.lt.s32.totalorder %s151_s18, %s151_s18 }
  0x15   : > { %p1791_p12 = scmp.ne.s32.totalorder %s151_s18, %s1790_s29  ;;  %p1799_p4 = scmp.lt.s32.totalorder %s1790_s29, %s1790_s29 }
  0x17   : > { %p1793_p13 = pnand %p1791_p12, %p1779_p7  ;;  %p1800_p3 = por %p1799_p4, %p1798_p1 }
  0x19   : > { %p1794_p0 = pneg %p1793_p13 }
  0x1b   : > { %p1801_p2 = pnand %p1800_p3, %p1794_p0 }
  0x1d   : > { %1804 = shalt.err (!%p1801_p2)
}
  0x1e   : > { %s1818_s30 = smov 128   ;;  %s1819_s5 = smov 8  }
  0x1f   : > { %1698 = dma.hbm_to_vmem [thread:$0]  (!%p1868_p5), %s2122_s2, 6144, %s151_s18, [#allocation3], %s1818_s30, %s1818_s30, %s1819_s5  }
  0x20   : > { %p2131_p6 = scmp.ne.s32.totalorder %s2128_s19, 0 }
  0x21   : > { %p2132_p8 = scmp.ne.s32.totalorder (!%p2131_p6), %s2129_s20, 0 }
  0x22   : > { %178 = sbr.rel (%p2131_p6) target bundleno = 1266 (0x4f2), region = 36 }
  0x29   : > { %1810 = dma.done.wait (%p2132_p8), [#allocation3], 6144  }
  0x2a   : > { %1812 = vsyncadd (%p2132_p8), [#allocation3], 4294961152  ;;  %s1236_s8 = sshll.u32 %s1229_s16, 4  ;;  %vm288_vm0 = vcmask 1041408   ;;  %vm239_vm1 = vcmask 80896   ;;  %vm1820_vm2 = vmmov 1  }
  0x2b   : > { %p205_p2 = scmp.lt.s32.totalorder %s1236_s8, 31  ;;  %vm1574_vm3 = vmpackc.low %vm288_vm0, %vm1820_vm2  ;;  %v232_v0 = vld [vmem:[%s2121_s1] sm:$0xff]  ;;  %v233_v1 = vld [vmem:[%s2121_s1 + $0x8] sm:$0x3] }
  0x2c   : > { %v1573_v3 = vpack.c.bf16 %v233_v1, %v232_v0  ;;  %v453_v6 = vld [vmem:[#allocation2] sm:$0xff]  ;;  %v454_v7 = vld [vmem:[#allocation2 + $0x8] sm:$0xff]  ;;  %v455_v8 = vld [vmem:[#allocation2 + $0x10] sm:$0xff] }
  0x2d   : > { %s2134_s8 = smov (!%p205_p2, %s1236_s8), 31  ;;  %v1579_v9 = vpack.c.bf16 %v454_v7, %v453_v6  ;;  %v456_v10 = vld [vmem:[#allocation2 + $0x18] sm:$0xff]  ;;  %v457_v13 = vld [vmem:[#allocation2 + $0x20] sm:$0xff]  ;;  %v458_v14 = vld [vmem:[#allocation2 + $0x28] sm:$0xff] }
  0x2e   : > { %s1237_s9 = sshll.u32 %s2134_s8, 3  ;;  %1575 = vmatprep.subr.msk.bf16.mxu0 %vm1574_vm3, %v1573_v3  ;;  %v1583_v12 = vpack.c.bf16 %v456_v10, %v455_v8  ;;  %v1587_v16 = vpack.c.bf16 %v458_v14, %v457_v13  ;;  %v459_v18 = vld [vmem:[#allocation2 + $0x30] sm:$0xff]  ;;  %v460_v19 = vld [vmem:[#allocation2 + $0x38] sm:$0xff]  ;;  %v461_v23 = vld [vmem:[#allocation2 + $0x40] sm:$0xff] }
  0x2f   : > { %s1904_s12 = scalar_lea.vmem %s2120_s0, %s1237_s9  ;;  %1578 = vmatpush3.bf16.msk.msra.mxu0 %vm1574_vm3, %v1573_v3  ;;  %1580 = vmatprep.subr.bf16.mxu1 %v1579_v9  ;;  %v1591_v21 = vpack.c.bf16 %v460_v19, %v459_v18  ;;  %v462_v24 = vld [vmem:[#allocation2 + $0x48] sm:$0xff]  ;;  %v463_v28 = vld [vmem:[#allocation2 + $0x50] sm:$0xff]  ;;  %v464_v29 = vld [vmem:[#allocation2 + $0x58] sm:$0xff]  ;;  %s2067_s28 = scalar_lea.vmem %s2124_s4, %s1237_s9 }
  0x30   : > { %v216_v2 = vld [vmem:[%s1904_s12] sm:$0xff]  ;;  %v217_v4 = vld [vmem:[%s1904_s12 + $0x8] sm:$0xff]  ;;  %v218_v5 = vld [vmem:[%s1904_s12 + $0x10] sm:$0xff]  ;;  %1582 = vmatpush3.bf16.msra.mxu1 %v1579_v9  ;;  %v1595_v26 = vpack.c.bf16 %v462_v24, %v461_v23  ;;  %v1599_v31 = vpack.c.bf16 %v464_v29, %v463_v28 }
  0x31   : > { %1381 = vmatprep.mubr.msk.f32.mxu0 %vm239_vm1, %v216_v2  ;;  %v219_v11 = vld [vmem:[%s1904_s12 + $0x18] sm:$0xff]  ;;  %v220_v15 = vld [vmem:[%s1904_s12 + $0x20] sm:$0xff]  ;;  %1584 = vmatprep.subr.bf16.mxu1 %v1583_v12  ;;  %v221_v17 = vld [vmem:[%s1904_s12 + $0x28] sm:$0xff] }
  0x32   : > { %1382 = vmatmul.mubr.msk.f32.vlgmr.msra.gmra.mrb[0].mxu0 %vm239_vm1, %v217_v4  ;;  %v222_v20 = vld [vmem:[%s1904_s12 + $0x30] sm:$0xff]  ;;  %v223_v22 = vld [vmem:[%s1904_s12 + $0x38] sm:$0xff]  ;;  %v224_v25 = vld [vmem:[%s1904_s12 + $0x40] sm:$0xff] }
  0x33   : > { %1384 = vmatprep.mubr.msk.f32.mxu0 %vm239_vm1, %v218_v5  ;;  %v225_v27 = vld [vmem:[%s1904_s12 + $0x48] sm:$0xff]  ;;  %v226_v30 = vld [vmem:[%s1904_s12 + $0x50] sm:$0xff]  ;;  %v227_v32 = vld [vmem:[%s1904_s12 + $0x58] sm:$0xff] }
  0x34   : > { %1586 = vmatpush3.bf16.msra.mxu1 %v1583_v12  ;;  %v465_v33 = vld [vmem:[#allocation2 + $0x60] sm:$0xff]  ;;  %v466_v34 = vld [vmem:[#allocation2 + $0x68] sm:$0xff]  ;;  %v230_v38 = vld [vmem:[%s1904_s12 + $0x70] sm:$0xff] }
  0x35   : > { %1588 = vmatprep.subr.bf16.mxu1 %v1587_v16  ;;  %v228_v35 = vld [vmem:[%s1904_s12 + $0x60] sm:$0xff]  ;;  %v1603_v36 = vpack.c.bf16 %v466_v34, %v465_v33  ;;  %v229_v37 = vld [vmem:[%s1904_s12 + $0x68] sm:$0xff]  ;;  %v231_v39 = vld [vmem:[%s1904_s12 + $0x78] sm:$0xff] }
  0x36   : > { %1385 = vmatmul.mubr.msk.f32.gmra.mrb[2].mxu0 %vm239_vm1, %v219_v11  ;;  %v467_v40 = vld [vmem:[#allocation2 + $0x70] sm:$0xff]  ;;  %v468_v41 = vld [vmem:[#allocation2 + $0x78] sm:$0xff]  ;;  %v636_v43 = vld [vmem:[#allocation2 + $0x80] sm:$0xff] }
  0x37   : > { %1387 = vmatprep.mubr.msk.f32.mxu0 %vm239_vm1, %v220_v15  ;;  %v1607_v42 = vpack.c.bf16 %v468_v41, %v467_v40  ;;  %v637_v44 = vld [vmem:[#allocation2 + $0x88] sm:$0xff]  ;;  %v638_v45 = vld [vmem:[#allocation2 + $0x90] sm:$0xff]  ;;  %v639_v47 = vld [vmem:[#allocation2 + $0x98] sm:$0xff] }
  0x38   : > { %1590 = vmatpush3.bf16.msra.mxu1 %v1587_v16  ;;  %v1611_v46 = vpack.c.bf16 %v637_v44, %v636_v43  ;;  %v1615_v48 = vpack.c.bf16 %v639_v47, %v638_v45  ;;  %v640_v49 = vld [vmem:[#allocation2 + $0xa0] sm:$0xff]  ;;  %v641_v50 = vld [vmem:[#allocation2 + $0xa8] sm:$0xff]  ;;  %v642_v52 = vld [vmem:[#allocation2 + $0xb0] sm:$0xff] }
  0x39   : > { %1592 = vmatprep.subr.bf16.mxu1 %v1591_v21  ;;  %v1619_v51 = vpack.c.bf16 %v641_v50, %v640_v49  ;;  %v643_v53 = vld [vmem:[#allocation2 + $0xb8] sm:$0xff]  ;;  %v644_v55 = vld [vmem:[#allocation2 + $0xc0] sm:$0xff]  ;;  %v645_v56 = vld [vmem:[#allocation2 + $0xc8] sm:$0xff] }
  0x3a   : > { %1388 = vmatmul.mubr.msk.f32.gmra.mrb[4].mxu0 %vm239_vm1, %v221_v17  ;;  %1612 = vmatprep.subr.bf16.mxu0 %v1611_v46  ;;  %v1623_v54 = vpack.c.bf16 %v643_v53, %v642_v52  ;;  %v1627_v57 = vpack.c.bf16 %v645_v56, %v644_v55  ;;  %v646_v58 = vld [vmem:[#allocation2 + $0xd0] sm:$0xff]  ;;  %v647_v59 = vld [vmem:[#allocation2 + $0xd8] sm:$0xff]  ;;  %v648_v61 = vld [vmem:[#allocation2 + $0xe0] sm:$0xff] }
  0x3b   : > { %1390 = vmatprep.mubr.msk.f32.mxu0 %vm239_vm1, %v222_v20  ;;  %1614 = vmatpush3.bf16.msra.mxu0 %v1611_v46  ;;  %v1631_v60 = vpack.c.bf16 %v647_v59, %v646_v58  ;;  %v649_v62 = vld [vmem:[#allocation2 + $0xe8] sm:$0xff]  ;;  %v1240_v0 = vld [vmem:[%s2123_s3] ss:$0 sm:$0xff]  ;;  %v650_v49 = vld [vmem:[#allocation2 + $0xf0] sm:$0xff] }
  0x3c   : > { %1594 = vmatpush3.bf16.msra.mxu1 %v1591_v21  ;;  %1616 = vmatprep.subr.bf16.mxu0 %v1615_v48  ;;  %v1635_v63 = vpack.c.bf16 %v649_v62, %v648_v61  ;;  %v651_v50 = vld [vmem:[#allocation2 + $0xf8] sm:$0xff]  ;;  %v819_v52 = vld [vmem:[#allocation2 + $0x100] sm:$0xff]  ;;  %v820_v53 = vld [vmem:[#allocation2 + $0x108] sm:$0xff] }
  0x3d   : > { %1596 = vmatprep.subr.bf16.mxu1 %v1595_v26  ;;  %v1643_v55 = vpack.c.bf16 %v820_v53, %v819_v52  ;;  %v822_v56 = vld [vmem:[#allocation2 + $0x118] sm:$0xff]  ;;  %v823_v58 = vld [vmem:[#allocation2 + $0x120] sm:$0xff]  ;;  %v824_v59 = vld [vmem:[#allocation2 + $0x128] sm:$0xff] }
  0x3e   : > { %1391 = vmatmul.mubr.msk.f32.gmra.mrb[6].mxu0 %vm239_vm1, %v223_v22  ;;  %v825_v61 = vld [vmem:[#allocation2 + $0x130] sm:$0xff]  ;;  %v826_v62 = vld [vmem:[#allocation2 + $0x138] sm:$0xff] }
  0x3f   : > { %1393 = vmatprep.mubr.msk.f32.mxu0 %vm239_vm1, %v224_v25  ;;  %1618 = vmatpush3.bf16.msra.mxu0 %v1615_v48 }
  0x40   : > { %1598 = vmatpush3.bf16.msra.mxu1 %v1595_v26  ;;  %1620 = vmatprep.subr.bf16.mxu0 %v1619_v51 }
  0x41   : > { %1600 = vmatprep.subr.bf16.mxu1 %v1599_v31 }
  0x42   : > { %1394 = vmatmul.mubr.msk.f32.gmra.mrb[8].mxu0 %vm239_vm1, %v225_v27 }
  0x43   : > { %1396 = vmatprep.mubr.msk.f32.mxu0 %vm239_vm1, %v226_v30  ;;  %1622 = vmatpush3.bf16.msra.mxu0 %v1619_v51  ;;  %v1639_v51 = vpack.c.bf16 %v651_v50, %v650_v49 }
  0x44   : > { %1602 = vmatpush3.bf16.msra.mxu1 %v1599_v31  ;;  %1624 = vmatprep.subr.bf16.mxu0 %v1623_v54 }
  0x45   : > { %1604 = vmatprep.subr.bf16.mxu1 %v1603_v36 }
  0x46   : > { %1397 = vmatmul.mubr.msk.f32.gmra.mrb[10].mxu0 %vm239_vm1, %v227_v32 }
  0x47   : > { %1399 = vmatprep.mubr.msk.f32.mxu0 %vm239_vm1, %v228_v35  ;;  %1626 = vmatpush3.bf16.msra.mxu0 %v1623_v54  ;;  %v821_v54 = vld [vmem:[#allocation2 + $0x110] sm:$0xff] }
  0x48   : > { %1606 = vmatpush3.bf16.msra.mxu1 %v1603_v36  ;;  %1628 = vmatprep.subr.bf16.mxu0 %v1627_v57 }
  0x49   : > { %1608 = vmatprep.subr.bf16.mxu1 %v1607_v42 }
  0x4a   : > { %1400 = vmatmul.mubr.msk.f32.gmra.mrb[12].mxu0 %vm239_vm1, %v229_v37 }
  0x4b   : > { %1402 = vmatprep.mubr.msk.f32.mxu0 %vm239_vm1, %v230_v38  ;;  %1630 = vmatpush3.bf16.msra.mxu0 %v1627_v57  ;;  %v1647_v57 = vpack.c.bf16 %v822_v56, %v821_v54 }
  0x4c   : > { %1610 = vmatpush3.bf16.msra.mxu1 %v1607_v42  ;;  %1632 = vmatprep.subr.bf16.mxu0 %v1631_v60 }
  0x4d   : > { %1675 = vmatprep.subr.bf16.mxu1 %v1643_v55 }
  0x4e   : > { %1403 = vmatmul.mubr.msk.f32.gmra.mrb[14].mxu0 %vm239_vm1, %v231_v39 }
  0x4f   : > { %1634 = vmatpush3.bf16.msra.mxu0 %v1631_v60  ;;  %v1651_v60 = vpack.c.bf16 %v824_v59, %v823_v58  ;;  %v833_v58 = vld [vmem:[#allocation2 + $0x170] sm:$0xff]  ;;  %v834_v59 = vld [vmem:[#allocation2 + $0x178] sm:$0xff] }
  0x50   : > { %1636 = vmatprep.subr.bf16.mxu0 %v1635_v63 }
  0x53   : > { %1638 = vmatpush3.bf16.msra.mxu0 %v1635_v63  ;;  %v1947_v63 = vpack.c.bf16 %v826_v62, %v825_v61  ;;  %v1259_v61 = vld [vmem:[%s2123_s3 + $0x2] ss:$0 sm:$0xff] }
  0x54   : > { %1640 = vmatprep.subr.bf16.mxu0 %v1639_v51 }
  0x57   : > { %1642 = vmatpush3.bf16.msra.mxu0 %v1639_v51 }
  0x58   : > { %1644 = vmatprep.subr.bf16.mxu0 %v1643_v55 }
 0x105   : > { %v1383_v1 = vpop.f32.mrb[0].mxu0 }
 0x106   : > { %v364_v2 = vadd.f32 %v1383_v1, %v1240_v0  ;;  %v358_v3 = vpop.f32.mrb[1].mxu0  ;;  %v828_v1 = vld [vmem:[#allocation2 + $0x148] sm:$0xff] }
 0x107   : > { %v359_v4 = vadd.f32 %v1240_v0, %v358_v3  ;;  %v829_v3 = vld [vmem:[#allocation2 + $0x150] sm:$0xff] }
 0x108   : > { %v438_v7 = vmax.f32 %v364_v2, 0.0 }
 0x109   : > { %v1386_v5 = vpop.f32.mrb[2].mxu0  ;;  %v437_v6 = vmax.f32 %v359_v4, 0.0  ;;  %v830_v4 = vld [vmem:[#allocation2 + $0x158] sm:$0xff] }
 0x10a   : > { %v374_v8 = vadd.f32 %v1386_v5, %v1240_v0  ;;  %v368_v9 = vpop.f32.mrb[3].mxu0  ;;  %v1954_v5 = vpack.c.bf16 %v830_v4, %v829_v3 }
 0x10b   : > { %v369_v10 = vadd.f32 %v1240_v0, %v368_v9  ;;  %1437 = vmatprep.mubr.f32.mxu1 %v437_v6  ;;  %v831_v6 = vld [vmem:[#allocation2 + $0x160] sm:$0xff] }
 0x10c   : > { %1438 = vmatmul.mubr.f32.vlgmr.msra.gmra.mrb[0].mxu1 %v438_v7  ;;  %v440_v13 = vmax.f32 %v374_v8, 0.0  ;;  %v832_v7 = vld [vmem:[#allocation2 + $0x168] sm:$0xff]  ;;  %v1966_v9 = vld [vmem:[%s2123_s3 + $0x1] ss:$0 sm:$0xff] }
 0x10d   : > { %v439_v11 = vmax.f32 %v369_v10, 0.0  ;;  %v1389_v12 = vpop.f32.mrb[4].mxu0  ;;  %1683 = vmatpush3.bf16.msra.mxu1 %v1643_v55  ;;  %v1958_v8 = vpack.c.bf16 %v832_v7, %v831_v6 }
 0x10e   : > { %v384_v14 = vadd.f32 %v1389_v12, %v1240_v0  ;;  %v378_v15 = vpop.f32.mrb[5].mxu0  ;;  %1676 = vmatprep.subr.bf16.mxu1 %v1647_v57 }
 0x10f   : > { %v379_v16 = vadd.f32 %v1240_v0, %v378_v15  ;;  %1440 = vmatprep.mubr.f32.mxu1 %v439_v11 }
 0x110   : > { %v442_v17 = vmax.f32 %v384_v14, 0.0  ;;  %1441 = vmatmul.mubr.f32.gmra.mrb[2].mxu1 %v440_v13 }
 0x111   : > { %v441_v18 = vmax.f32 %v379_v16, 0.0  ;;  %v1392_v19 = vpop.f32.mrb[6].mxu0  ;;  %1684 = vmatpush3.bf16.msra.mxu1 %v1647_v57 }
 0x112   : > { %v394_v20 = vadd.f32 %v1392_v19, %v1240_v0  ;;  %v388_v21 = vpop.f32.mrb[7].mxu0  ;;  %1677 = vmatprep.subr.bf16.mxu1 %v1651_v60 }
 0x113   : > { %v389_v22 = vadd.f32 %v1240_v0, %v388_v21  ;;  %1443 = vmatprep.mubr.f32.mxu1 %v441_v18 }
 0x114   : > { %v444_v23 = vmax.f32 %v394_v20, 0.0  ;;  %1444 = vmatmul.mubr.f32.gmra.mrb[4].mxu1 %v442_v17 }
 0x115   : > { %v443_v24 = vmax.f32 %v389_v22, 0.0  ;;  %v1395_v25 = vpop.f32.mrb[8].mxu0  ;;  %1685 = vmatpush3.bf16.msra.mxu1 %v1651_v60 }
 0x116   : > { %v404_v26 = vadd.f32 %v1395_v25, %v1240_v0  ;;  %v398_v27 = vpop.f32.mrb[9].mxu0  ;;  %1678 = vmatprep.subr.bf16.mxu1 %v1947_v63 }
 0x117   : > { %v399_v28 = vadd.f32 %v1240_v0, %v398_v27  ;;  %1446 = vmatprep.mubr.f32.mxu1 %v443_v24 }
 0x118   : > { %v446_v29 = vmax.f32 %v404_v26, 0.0  ;;  %1447 = vmatmul.mubr.f32.gmra.mrb[6].mxu1 %v444_v23 }
 0x119   : > { %v445_v30 = vmax.f32 %v399_v28, 0.0  ;;  %v1398_v31 = vpop.f32.mrb[10].mxu0  ;;  %1686 = vmatpush3.bf16.msra.mxu1 %v1947_v63 }
 0x11a   : > { %v414_v32 = vadd.f32 %v1398_v31, %v1240_v0  ;;  %v408_v33 = vpop.f32.mrb[11].mxu0 }
 0x11b   : > { %v409_v34 = vadd.f32 %v1240_v0, %v408_v33  ;;  %1449 = vmatprep.mubr.f32.mxu1 %v445_v30 }
 0x11c   : > { %v448_v35 = vmax.f32 %v414_v32, 0.0  ;;  %1450 = vmatmul.mubr.f32.gmra.mrb[8].mxu1 %v446_v29 }
 0x11d   : > { %v447_v36 = vmax.f32 %v409_v34, 0.0  ;;  %v1401_v37 = vpop.f32.mrb[12].mxu0 }
 0x11e   : > { %v424_v38 = vadd.f32 %v1401_v37, %v1240_v0  ;;  %v418_v39 = vpop.f32.mrb[13].mxu0 }
 0x11f   : > { %v419_v40 = vadd.f32 %v1240_v0, %v418_v39  ;;  %1452 = vmatprep.mubr.f32.mxu1 %v447_v36 }
 0x120   : > { %v450_v41 = vmax.f32 %v424_v38, 0.0  ;;  %1453 = vmatmul.mubr.f32.gmra.mrb[10].mxu1 %v448_v35 }
 0x121   : > { %v449_v42 = vmax.f32 %v419_v40, 0.0  ;;  %v1404_v43 = vpop.f32.mrb[14].mxu0 }
 0x122   : > { %v434_v44 = vadd.f32 %v1404_v43, %v1240_v0  ;;  %v428_v45 = vpop.f32.mrb[15].mxu0 }
 0x123   : > { %v429_v46 = vadd.f32 %v1240_v0, %v428_v45  ;;  %1455 = vmatprep.mubr.f32.mxu1 %v449_v42  ;;  %v827_v0 = vld [vmem:[#allocation2 + $0x140] sm:$0xff] }
 0x124   : > { %v452_v47 = vmax.f32 %v434_v44, 0.0  ;;  %1456 = vmatmul.mubr.f32.gmra.mrb[12].mxu1 %v450_v41  ;;  %v1950_v2 = vpack.c.bf16 %v828_v1, %v827_v0 }
 0x125   : > { %v451_v48 = vmax.f32 %v429_v46, 0.0 }
 0x126   : > { %1679 = vmatprep.subr.bf16.mxu1 %v1950_v2 }
 0x127   : > { %1458 = vmatprep.mubr.f32.mxu1 %v451_v48  ;;  %1687 = vmatpush3.bf16.msra.mxu1 %v1950_v2 }
 0x128   : > { %1459 = vmatmul.mubr.f32.gmra.mrb[14].mxu1 %v452_v47  ;;  %1680 = vmatprep.subr.bf16.mxu1 %v1954_v5 }
 0x12b   : > { %1688 = vmatpush3.bf16.msra.mxu1 %v1954_v5 }
 0x12c   : > { %1681 = vmatprep.subr.bf16.mxu1 %v1958_v8 }
 0x12f   : > { %1689 = vmatpush3.bf16.msra.mxu1 %v1958_v8 }
 0x1df   : > { %v1439_v10 = vpop.f32.mrb[0].mxu1 }
 0x1e0   : > { %v546_v11 = vadd.f32 %v1439_v10, %v1966_v9  ;;  %v540_v12 = vpop.f32.mrb[1].mxu1 }
 0x1e1   : > { %v541_v13 = vadd.f32 %v1966_v9, %v540_v12 }
 0x1e2   : > { %v620_v16 = vmax.f32 %v546_v11, 0.0 }
 0x1e3   : > { %v619_v14 = vmax.f32 %v541_v13, 0.0  ;;  %v1442_v15 = vpop.f32.mrb[2].mxu1 }
 0x1e4   : > { %v556_v17 = vadd.f32 %v1442_v15, %v1966_v9  ;;  %v550_v18 = vpop.f32.mrb[3].mxu1 }
 0x1e5   : > { %v551_v19 = vadd.f32 %v1966_v9, %v550_v18  ;;  %1493 = vmatprep.mubr.f32.mxu0 %v619_v14 }
 0x1e6   : > { %1494 = vmatmul.mubr.f32.vlgmr.msra.gmra.mrb[16].mxu0 %v620_v16  ;;  %v622_v22 = vmax.f32 %v556_v17, 0.0 }
 0x1e7   : > { %v621_v20 = vmax.f32 %v551_v19, 0.0  ;;  %v1445_v21 = vpop.f32.mrb[4].mxu1  ;;  %1646 = vmatpush3.bf16.msra.mxu0 %v1643_v55 }
 0x1e8   : > { %v566_v23 = vadd.f32 %v1445_v21, %v1966_v9  ;;  %v560_v24 = vpop.f32.mrb[5].mxu1  ;;  %1648 = vmatprep.subr.bf16.mxu0 %v1647_v57 }
 0x1e9   : > { %v561_v25 = vadd.f32 %v1966_v9, %v560_v24  ;;  %1496 = vmatprep.mubr.f32.mxu0 %v621_v20 }
 0x1ea   : > { %v624_v26 = vmax.f32 %v566_v23, 0.0  ;;  %1497 = vmatmul.mubr.f32.gmra.mrb[18].mxu0 %v622_v22 }
 0x1eb   : > { %v623_v27 = vmax.f32 %v561_v25, 0.0  ;;  %v1448_v28 = vpop.f32.mrb[6].mxu1  ;;  %1650 = vmatpush3.bf16.msra.mxu0 %v1647_v57 }
 0x1ec   : > { %v576_v29 = vadd.f32 %v1448_v28, %v1966_v9  ;;  %v570_v30 = vpop.f32.mrb[7].mxu1  ;;  %1652 = vmatprep.subr.bf16.mxu0 %v1651_v60 }
 0x1ed   : > { %v571_v31 = vadd.f32 %v1966_v9, %v570_v30  ;;  %1499 = vmatprep.mubr.f32.mxu0 %v623_v27 }
 0x1ee   : > { %v626_v32 = vmax.f32 %v576_v29, 0.0  ;;  %1500 = vmatmul.mubr.f32.gmra.mrb[20].mxu0 %v624_v26 }
 0x1ef   : > { %v625_v33 = vmax.f32 %v571_v31, 0.0  ;;  %v1451_v34 = vpop.f32.mrb[8].mxu1  ;;  %1654 = vmatpush3.bf16.msra.mxu0 %v1651_v60  ;;  %v1671_v60 = vpack.c.bf16 %v834_v59, %v833_v58 }
 0x1f0   : > { %v586_v35 = vadd.f32 %v1451_v34, %v1966_v9  ;;  %v580_v36 = vpop.f32.mrb[9].mxu1  ;;  %1656 = vmatprep.subr.bf16.mxu0 %v1947_v63 }
 0x1f1   : > { %v581_v37 = vadd.f32 %v1966_v9, %v580_v36  ;;  %1502 = vmatprep.mubr.f32.mxu0 %v625_v33  ;;  %1682 = vmatprep.subr.bf16.mxu1 %v1671_v60 }
 0x1f2   : > { %v628_v38 = vmax.f32 %v586_v35, 0.0  ;;  %1503 = vmatmul.mubr.f32.gmra.mrb[22].mxu0 %v626_v32  ;;  %1690 = vmatpush3.bf16.msra.mxu1 %v1671_v60 }
 0x1f3   : > { %v627_v39 = vmax.f32 %v581_v37, 0.0  ;;  %v1454_v40 = vpop.f32.mrb[10].mxu1  ;;  %1658 = vmatpush3.bf16.msra.mxu0 %v1947_v63 }
 0x1f4   : > { %v596_v41 = vadd.f32 %v1454_v40, %v1966_v9  ;;  %v590_v42 = vpop.f32.mrb[11].mxu1  ;;  %1660 = vmatprep.subr.bf16.mxu0 %v1950_v2 }
 0x1f5   : > { %v591_v43 = vadd.f32 %v1966_v9, %v590_v42  ;;  %1505 = vmatprep.mubr.f32.mxu0 %v627_v39 }
 0x1f6   : > { %v630_v44 = vmax.f32 %v596_v41, 0.0  ;;  %1506 = vmatmul.mubr.f32.gmra.mrb[24].mxu0 %v628_v38 }
 0x1f7   : > { %v629_v45 = vmax.f32 %v591_v43, 0.0  ;;  %v1457_v46 = vpop.f32.mrb[12].mxu1  ;;  %1662 = vmatpush3.bf16.msra.mxu0 %v1950_v2 }
 0x1f8   : > { %v606_v47 = vadd.f32 %v1457_v46, %v1966_v9  ;;  %v600_v48 = vpop.f32.mrb[13].mxu1  ;;  %1664 = vmatprep.subr.bf16.mxu0 %v1954_v5  ;;  %v1260_v46 = vld [vmem:[%s2123_s3 + $0x3] ss:$0 sm:$0xff] }
 0x1f9   : > { %v601_v49 = vadd.f32 %v1966_v9, %v600_v48  ;;  %1508 = vmatprep.mubr.f32.mxu0 %v629_v45 }
 0x1fa   : > { %v632_v50 = vmax.f32 %v606_v47, 0.0  ;;  %1509 = vmatmul.mubr.f32.gmra.mrb[26].mxu0 %v630_v44 }
 0x1fb   : > { %v631_v51 = vmax.f32 %v601_v49, 0.0  ;;  %v1460_v52 = vpop.f32.mrb[14].mxu1  ;;  %1666 = vmatpush3.bf16.msra.mxu0 %v1954_v5 }
 0x1fc   : > { %v616_v53 = vadd.f32 %v1460_v52, %v1966_v9  ;;  %v610_v54 = vpop.f32.mrb[15].mxu1  ;;  %1668 = vmatprep.subr.bf16.mxu0 %v1958_v8 }
 0x1fd   : > { %v611_v55 = vadd.f32 %v1966_v9, %v610_v54  ;;  %1511 = vmatprep.mubr.f32.mxu0 %v631_v51 }
 0x1fe   : > { %v634_v56 = vmax.f32 %v616_v53, 0.0  ;;  %1512 = vmatmul.mubr.f32.gmra.mrb[28].mxu0 %v632_v50 }
 0x1ff   : > { %v633_v57 = vmax.f32 %v611_v55, 0.0  ;;  %1670 = vmatpush3.bf16.msra.mxu0 %v1958_v8 }
 0x200   : > { %1672 = vmatprep.subr.bf16.mxu0 %v1671_v60 }
 0x201   : > { %1514 = vmatprep.mubr.f32.mxu0 %v633_v57 }
 0x202   : > { %1515 = vmatmul.mubr.f32.gmra.mrb[30].mxu0 %v634_v56 }
 0x203   : > { %1674 = vmatpush3.bf16.msra.mxu0 %v1671_v60 }
 0x2b9   : > { %v1495_v62 = vpop.f32.mrb[16].mxu0 }
 0x2ba   : > { %v729_v63 = vadd.f32 %v1495_v62, %v1259_v61  ;;  %v723_v0 = vpop.f32.mrb[17].mxu0 }
 0x2bb   : > { %v724_v1 = vadd.f32 %v1259_v61, %v723_v0 }
 0x2bc   : > { %v803_v4 = vmax.f32 %v729_v63, 0.0 }
 0x2bd   : > { %v802_v2 = vmax.f32 %v724_v1, 0.0  ;;  %v1498_v3 = vpop.f32.mrb[18].mxu0 }
 0x2be   : > { %v739_v5 = vadd.f32 %v1498_v3, %v1259_v61  ;;  %v733_v6 = vpop.f32.mrb[19].mxu0 }
 0x2bf   : > { %v734_v7 = vadd.f32 %v1259_v61, %v733_v6  ;;  %1549 = vmatprep.mubr.f32.mxu0 %v802_v2 }
 0x2c0   : > { %1550 = vmatmul.mubr.f32.vlgmr.msra.gmra.mrb[32].mxu0 %v803_v4  ;;  %v805_v10 = vmax.f32 %v739_v5, 0.0 }
 0x2c1   : > { %v804_v8 = vmax.f32 %v734_v7, 0.0  ;;  %v1501_v9 = vpop.f32.mrb[20].mxu0 }
 0x2c2   : > { %v749_v11 = vadd.f32 %v1501_v9, %v1259_v61  ;;  %v743_v12 = vpop.f32.mrb[21].mxu0 }
 0x2c3   : > { %v744_v13 = vadd.f32 %v1259_v61, %v743_v12  ;;  %1552 = vmatprep.mubr.f32.mxu0 %v804_v8 }
 0x2c4   : > { %1553 = vmatmul.mubr.f32.gmra.mrb[34].mxu0 %v805_v10  ;;  %v807_v16 = vmax.f32 %v749_v11, 0.0 }
 0x2c5   : > { %v806_v14 = vmax.f32 %v744_v13, 0.0  ;;  %v1504_v15 = vpop.f32.mrb[22].mxu0 }
 0x2c6   : > { %v759_v17 = vadd.f32 %v1504_v15, %v1259_v61  ;;  %v753_v18 = vpop.f32.mrb[23].mxu0 }
 0x2c7   : > { %v754_v19 = vadd.f32 %v1259_v61, %v753_v18  ;;  %1555 = vmatprep.mubr.f32.mxu0 %v806_v14 }
 0x2c8   : > { %1556 = vmatmul.mubr.f32.gmra.mrb[36].mxu0 %v807_v16  ;;  %v809_v22 = vmax.f32 %v759_v17, 0.0 }
 0x2c9   : > { %v808_v20 = vmax.f32 %v754_v19, 0.0  ;;  %v1507_v21 = vpop.f32.mrb[24].mxu0 }
 0x2ca   : > { %v769_v23 = vadd.f32 %v1507_v21, %v1259_v61  ;;  %v763_v24 = vpop.f32.mrb[25].mxu0 }
 0x2cb   : > { %v764_v25 = vadd.f32 %v1259_v61, %v763_v24  ;;  %1558 = vmatprep.mubr.f32.mxu1 %v808_v20 }
 0x2cc   : > { %1559 = vmatmul.mubr.f32.vlgmr.msra.gmra.mrb[16].mxu1 %v809_v22  ;;  %v811_v28 = vmax.f32 %v769_v23, 0.0 }
 0x2cd   : > { %v810_v26 = vmax.f32 %v764_v25, 0.0  ;;  %v1510_v27 = vpop.f32.mrb[26].mxu0 }
 0x2ce   : > { %v779_v29 = vadd.f32 %v1510_v27, %v1259_v61  ;;  %v773_v30 = vpop.f32.mrb[27].mxu0 }
 0x2cf   : > { %v774_v31 = vadd.f32 %v1259_v61, %v773_v30  ;;  %1561 = vmatprep.mubr.f32.mxu1 %v810_v26 }
 0x2d0   : > { %1562 = vmatmul.mubr.f32.gmra.mrb[18].mxu1 %v811_v28  ;;  %v813_v34 = vmax.f32 %v779_v29, 0.0 }
 0x2d1   : > { %v812_v32 = vmax.f32 %v774_v31, 0.0  ;;  %v1513_v33 = vpop.f32.mrb[28].mxu0 }
 0x2d2   : > { %v789_v35 = vadd.f32 %v1513_v33, %v1259_v61  ;;  %v783_v36 = vpop.f32.mrb[29].mxu0 }
 0x2d3   : > { %v784_v37 = vadd.f32 %v1259_v61, %v783_v36  ;;  %1564 = vmatprep.mubr.f32.mxu1 %v812_v32 }
 0x2d4   : > { %1565 = vmatmul.mubr.f32.gmra.mrb[20].mxu1 %v813_v34  ;;  %v815_v40 = vmax.f32 %v789_v35, 0.0 }
 0x2d5   : > { %v814_v38 = vmax.f32 %v784_v37, 0.0  ;;  %v1516_v39 = vpop.f32.mrb[30].mxu0 }
 0x2d6   : > { %v799_v41 = vadd.f32 %v1516_v39, %v1259_v61  ;;  %v793_v42 = vpop.f32.mrb[31].mxu0 }
 0x2d7   : > { %v794_v43 = vadd.f32 %v1259_v61, %v793_v42  ;;  %1567 = vmatprep.mubr.f32.mxu1 %v814_v38 }
 0x2d8   : > { %1568 = vmatmul.mubr.f32.gmra.mrb[22].mxu1 %v815_v40  ;;  %v817_v45 = vmax.f32 %v799_v41, 0.0 }
 0x2d9   : > { %v816_v44 = vmax.f32 %v794_v43, 0.0 }
 0x2db   : > { %1570 = vmatprep.mubr.f32.mxu1 %v816_v44 }
 0x2dc   : > { %1571 = vmatmul.mubr.f32.gmra.mrb[24].mxu1 %v817_v45 }
 0x393   : > { %v1551_v47 = vpop.f32.mrb[32].mxu0 }
 0x394   : > { %v912_v48 = vadd.f32 %v1551_v47, %v1260_v46  ;;  %v906_v49 = vpop.f32.mrb[33].mxu0 }
 0x395   : > { %v907_v51 = vadd.f32 %v1260_v46, %v906_v49 }
 0x396   : > { %987 = vmax.xlane.f32.xlu0 %v912_v48 }
 0x397   : > { %v1554_v50 = vpop.f32.mrb[34].mxu0 }
 0x398   : > { %v922_v52 = vadd.f32 %v1554_v50, %v1260_v46  ;;  %v916_v53 = vpop.f32.mrb[35].mxu0 }
 0x399   : > { %v917_v55 = vadd.f32 %v1260_v46, %v916_v53 }
 0x39a   : > { %991 = vmax.xlane.f32.xlu1 %v922_v52  ;;  %985 = vmax.xlane.f32.xlu0 %v907_v51 }
 0x39b   : > { %v1557_v54 = vpop.f32.mrb[36].mxu0 }
 0x39c   : > { %v926_v56 = vpop.f32.mrb[37].mxu0  ;;  %v932_v59 = vadd.f32 %v1557_v54, %v1260_v46 }
 0x39d   : > { %v927_v57 = vadd.f32 %v1260_v46, %v926_v56 }
 0x39e   : > { %989 = vmax.xlane.f32.xlu1 %v917_v55 }
 0x39f   : > { %v1560_v58 = vpop.f32.mrb[16].mxu1  ;;  %993 = vmax.xlane.f32.xlu0 %v927_v57 }
 0x3a0   : > { %v936_v60 = vpop.f32.mrb[17].mxu1  ;;  %v942_v63 = vadd.f32 %v1560_v58, %v1260_v46 }
 0x3a1   : > { %v937_v61 = vadd.f32 %v1260_v46, %v936_v60 }
 0x3a2   : > { %995 = vmax.xlane.f32.xlu1 %v932_v59 }
 0x3a3   : > { %v1563_v62 = vpop.f32.mrb[18].mxu1  ;;  %997 = vmax.xlane.f32.xlu0 %v937_v61 }
 0x3a4   : > { %v946_v0 = vpop.f32.mrb[19].mxu1  ;;  %v952_v3 = vadd.f32 %v1563_v62, %v1260_v46 }
 0x3a5   : > { %v947_v1 = vadd.f32 %v1260_v46, %v946_v0 }
 0x3a6   : > { %999 = vmax.xlane.f32.xlu1 %v942_v63 }
 0x3a7   : > { %v1566_v2 = vpop.f32.mrb[20].mxu1  ;;  %1001 = vmax.xlane.f32.xlu0 %v947_v1 }
 0x3a8   : > { %v956_v4 = vpop.f32.mrb[21].mxu1  ;;  %v962_v7 = vadd.f32 %v1566_v2, %v1260_v46 }
 0x3a9   : > { %v957_v5 = vadd.f32 %v1260_v46, %v956_v4 }
 0x3aa   : > { %1003 = vmax.xlane.f32.xlu1 %v952_v3 }
 0x3ab   : > { %v1569_v6 = vpop.f32.mrb[22].mxu1  ;;  %1005 = vmax.xlane.f32.xlu0 %v957_v5 }
 0x3ac   : > { %v966_v8 = vpop.f32.mrb[23].mxu1  ;;  %v2001_v11 = vadd.f32 %v1569_v6, %v1260_v46 }
 0x3ad   : > { %v1998_v9 = vadd.f32 %v1260_v46, %v966_v8 }
 0x3ae   : > { %1007 = vmax.xlane.f32.xlu1 %v962_v7 }
 0x3af   : > { %v1572_v10 = vpop.f32.mrb[24].mxu1  ;;  %1009 = vmax.xlane.f32.xlu0 %v1998_v9 }
 0x3b0   : > { %v976_v12 = vpop.f32.mrb[25].mxu1  ;;  %v2007_v14 = vadd.f32 %v1572_v10, %v1260_v46 }
 0x3b1   : > { %v2003_v13 = vadd.f32 %v1260_v46, %v976_v12 }
 0x3b2   : > { %1011 = vmax.xlane.f32.xlu1 %v2001_v11 }
 0x3b3   : > { %1013 = vmax.xlane.f32.xlu0 %v2003_v13 }
 0x3b6   : > { %1015 = vmax.xlane.f32.xlu1 %v2007_v14 }
 0x423   : > { %v988_v15 = vpop.xlane.xlu0 %987 }
 0x424   : > { %v2010_v16 = vsub.f32 %v912_v48, %v988_v15 }
 0x426   : > { %v1035_v17 = vmul.f32 1.442695, %v2010_v16 }
 0x427   : > { %v992_v18 = vpop.xlane.xlu1 %991  ;;  %v986_v19 = vpop.xlane.xlu0 %985 }
 0x428   : > { %1713 = vpow2.f32 %v1035_v17  ;;  %v2013_v20 = vsub.f32 %v922_v52, %v992_v18  ;;  %v2015_v21 = vsub.f32 %v907_v51, %v986_v19 }
 0x42a   : > { %v1039_v22 = vmul.f32 1.442695, %v2013_v20  ;;  %v1033_v23 = vmul.f32 1.442695, %v2015_v21 }
 0x42b   : > { %v990_v24 = vpop.xlane.xlu1 %989 }
 0x42c   : > { %1715 = vpow2.f32 %v1039_v22  ;;  %v2019_v25 = vsub.f32 %v917_v55, %v990_v24  ;;  %v994_v26 = vpop.xlane.xlu0 %993 }
 0x42d   : > { %1717 = vpow2.f32 %v1033_v23  ;;  %v2021_v27 = vsub.f32 %v927_v57, %v994_v26 }
 0x42e   : > { %v1037_v28 = vmul.f32 1.442695, %v2019_v25 }
 0x42f   : > { %v996_v29 = vpop.xlane.xlu1 %995  ;;  %v1041_v32 = vmul.f32 1.442695, %v2021_v27 }
 0x430   : > { %1719 = vpow2.f32 %v1037_v28  ;;  %v2024_v30 = vsub.f32 %v932_v59, %v996_v29  ;;  %v998_v31 = vpop.xlane.xlu0 %997 }
 0x431   : > { %v2027_v33 = vsub.f32 %v937_v61, %v998_v31 }
 0x432   : > { %v1714_v34 = vpop.eup %1713  ;;  %v1043_v35 = vmul.f32 1.442695, %v2024_v30 }
 0x433   : > { %1067 = vadd.xlane.f32.xlu1 %v1714_v34  ;;  %v1000_v36 = vpop.xlane.xlu1 %999  ;;  %v1045_v39 = vmul.f32 1.442695, %v2027_v33 }
 0x434   : > { %1721 = vpow2.f32 %v1043_v35  ;;  %v2030_v37 = vsub.f32 %v942_v63, %v1000_v36  ;;  %v1002_v38 = vpop.xlane.xlu0 %1001 }
 0x435   : > { %1723 = vpow2.f32 %v1041_v32  ;;  %v2033_v40 = vsub.f32 %v947_v1, %v1002_v38 }
 0x436   : > { %v1716_v41 = vpop.eup %1715  ;;  %v1047_v42 = vmul.f32 1.442695, %v2030_v37 }
 0x437   : > { %v1718_v43 = vpop.eup %1717  ;;  %1071 = vadd.xlane.f32.xlu1 %v1716_v41  ;;  %v1004_v44 = vpop.xlane.xlu1 %1003  ;;  %v1049_v47 = vmul.f32 1.442695, %v2033_v40 }
 0x438   : > { %1725 = vpow2.f32 %v1047_v42  ;;  %v2036_v45 = vsub.f32 %v952_v3, %v1004_v44  ;;  %1065 = vadd.xlane.f32.xlu0 %v1718_v43  ;;  %v1006_v46 = vpop.xlane.xlu0 %1005 }
 0x439   : > { %1727 = vpow2.f32 %v1045_v39  ;;  %v2039_v48 = vsub.f32 %v957_v5, %v1006_v46 }
 0x43a   : > { %v1720_v49 = vpop.eup %1719  ;;  %v1051_v50 = vmul.f32 1.442695, %v2036_v45 }
 0x43b   : > { %v1008_v51 = vpop.xlane.xlu1 %1007  ;;  %v1053_v54 = vmul.f32 1.442695, %v2039_v48 }
 0x43c   : > { %1729 = vpow2.f32 %v1051_v50  ;;  %v2042_v52 = vsub.f32 %v962_v7, %v1008_v51  ;;  %1069 = vadd.xlane.f32.xlu0 %v1720_v49  ;;  %v1010_v53 = vpop.xlane.xlu0 %1009 }
 0x43d   : > { %1731 = vpow2.f32 %v1049_v47  ;;  %v2046_v55 = vsub.f32 %v1998_v9, %v1010_v53 }
 0x43e   : > { %v1722_v56 = vpop.eup %1721  ;;  %v1055_v57 = vmul.f32 1.442695, %v2042_v52 }
 0x43f   : > { %v1724_v58 = vpop.eup %1723  ;;  %1075 = vadd.xlane.f32.xlu1 %v1722_v56  ;;  %v1012_v59 = vpop.xlane.xlu1 %1011  ;;  %v1057_v62 = vmul.f32 1.442695, %v2046_v55 }
 0x440   : > { %1733 = vpow2.f32 %v1055_v57  ;;  %v2050_v60 = vsub.f32 %v2001_v11, %v1012_v59  ;;  %1073 = vadd.xlane.f32.xlu0 %v1724_v58  ;;  %v1014_v61 = vpop.xlane.xlu0 %1013 }
 0x441   : > { %1735 = vpow2.f32 %v1053_v54  ;;  %v2054_v63 = vsub.f32 %v2003_v13, %v1014_v61 }
 0x442   : > { %v1726_v0 = vpop.eup %1725  ;;  %v1059_v1 = vmul.f32 1.442695, %v2050_v60 }
 0x443   : > { %v1728_v2 = vpop.eup %1727  ;;  %1079 = vadd.xlane.f32.xlu1 %v1726_v0  ;;  %v1016_v3 = vpop.xlane.xlu1 %1015  ;;  %v1061_v5 = vmul.f32 1.442695, %v2054_v63 }
 0x444   : > { %1737 = vpow2.f32 %v1059_v1  ;;  %v2058_v4 = vsub.f32 %v2007_v14, %v1016_v3  ;;  %1077 = vadd.xlane.f32.xlu0 %v1728_v2 }
 0x445   : > { %1739 = vpow2.f32 %v1057_v62 }
 0x446   : > { %v1730_v6 = vpop.eup %1729  ;;  %v1063_v7 = vmul.f32 1.442695, %v2058_v4 }
 0x447   : > { %v1732_v8 = vpop.eup %1731  ;;  %1083 = vadd.xlane.f32.xlu1 %v1730_v6 }
 0x448   : > { %1741 = vpow2.f32 %v1063_v7  ;;  %1081 = vadd.xlane.f32.xlu0 %v1732_v8 }
 0x449   : > { %1743 = vpow2.f32 %v1061_v5 }
 0x44a   : > { %v1734_v9 = vpop.eup %1733 }
 0x44b   : > { %v1736_v10 = vpop.eup %1735  ;;  %1087 = vadd.xlane.f32.xlu1 %v1734_v9 }
 0x44c   : > { %1085 = vadd.xlane.f32.xlu0 %v1736_v10 }
 0x44e   : > { %v1738_v11 = vpop.eup %1737 }
 0x44f   : > { %v1740_v12 = vpop.eup %1739  ;;  %1091 = vadd.xlane.f32.xlu1 %v1738_v11 }
 0x450   : > { %1089 = vadd.xlane.f32.xlu0 %v1740_v12 }
 0x452   : > { %v1742_v13 = vpop.eup %1741 }
 0x453   : > { %v1744_v14 = vpop.eup %1743  ;;  %1095 = vadd.xlane.f32.xlu1 %v1742_v13 }
 0x454   : > { %1093 = vadd.xlane.f32.xlu0 %v1744_v14 }
 0x4c0   : > { %v1068_v15 = vpop.xlane.xlu1 %1067 }
 0x4c1   : > { %1745 = vlog2.f32 %v1068_v15 }
 0x4c4   : > { %v1072_v17 = vpop.xlane.xlu1 %1071 }
 0x4c5   : > { %1747 = vlog2.f32 %v1072_v17  ;;  %v1066_v18 = vpop.xlane.xlu0 %1065 }
 0x4c6   : > { %1749 = vlog2.f32 %v1066_v18 }
 0x4c9   : > { %v1070_v19 = vpop.xlane.xlu0 %1069 }
 0x4ca   : > { %1751 = vlog2.f32 %v1070_v19 }
 0x4cb   : > { %v1746_v22 = vpop.eup %1745 }
 0x4cc   : > { %v1100_v23 = vmul.f32 0.6931472, %v1746_v22  ;;  %v1076_v24 = vpop.xlane.xlu1 %1075 }
 0x4cd   : > { %1753 = vlog2.f32 %v1076_v24  ;;  %v1074_v26 = vpop.xlane.xlu0 %1073 }
 0x4ce   : > { %v1130_v28 = vsub.f32 %v2010_v16, %v1100_v23  ;;  %1755 = vlog2.f32 %v1074_v26 }
 0x4cf   : > { %v1748_v29 = vpop.eup %1747 }
 0x4d0   : > { %v1750_v31 = vpop.eup %1749  ;;  %1146 = vst.msk [vmem:[%s2067_s28 + $0x8] sm:$0xff] %vm239_vm1, %v1130_v28  ;;  %v1104_v32 = vmul.f32 0.6931472, %v1748_v29  ;;  %v1080_v34 = vpop.xlane.xlu1 %1079 }
 0x4d1   : > { %v1098_v35 = vmul.f32 0.6931472, %v1750_v31  ;;  %1757 = vlog2.f32 %v1080_v34  ;;  %v1078_v36 = vpop.xlane.xlu0 %1077 }
 0x4d2   : > { %v1132_v38 = vsub.f32 %v2013_v20, %v1104_v32  ;;  %1759 = vlog2.f32 %v1078_v36 }
 0x4d3   : > { %v1129_v39 = vsub.f32 %v2015_v21, %v1098_v35 }
 0x4d4   : > { %v1752_v41 = vpop.eup %1751  ;;  %1148 = vst.msk [vmem:[%s2067_s28 + $0x18] sm:$0xff] %vm239_vm1, %v1132_v38  ;;  %v1084_v16 = vpop.xlane.xlu1 %1083 }
 0x4d5   : > { %1145 = vst.msk [vmem:[%s2067_s28] sm:$0xff] %vm239_vm1, %v1129_v39  ;;  %v1102_v42 = vmul.f32 0.6931472, %v1752_v41  ;;  %1761 = vlog2.f32 %v1084_v16  ;;  %v1082_v43 = vpop.xlane.xlu0 %1081 }
 0x4d6   : > { %1763 = vlog2.f32 %v1082_v43 }
 0x4d7   : > { %v1754_v44 = vpop.eup %1753  ;;  %v1131_v46 = vsub.f32 %v2019_v25, %v1102_v42 }
 0x4d8   : > { %v1756_v20 = vpop.eup %1755  ;;  %v1108_v47 = vmul.f32 0.6931472, %v1754_v44  ;;  %v1088_v49 = vpop.xlane.xlu1 %1087 }
 0x4d9   : > { %1147 = vst.msk [vmem:[%s2067_s28 + $0x10] sm:$0xff] %vm239_vm1, %v1131_v46  ;;  %v1106_v21 = vmul.f32 0.6931472, %v1756_v20  ;;  %1765 = vlog2.f32 %v1088_v49  ;;  %v1086_v50 = vpop.xlane.xlu0 %1085 }
 0x4da   : > { %v1134_v51 = vsub.f32 %v2024_v30, %v1108_v47  ;;  %1767 = vlog2.f32 %v1086_v50 }
 0x4db   : > { %v1758_v53 = vpop.eup %1757  ;;  %v1133_v54 = vsub.f32 %v2021_v27, %v1106_v21 }
 0x4dc   : > { %v1760_v56 = vpop.eup %1759  ;;  %1150 = vst.msk [vmem:[%s2067_s28 + $0x28] sm:$0xff] %vm239_vm1, %v1134_v51  ;;  %v1112_v25 = vmul.f32 0.6931472, %v1758_v53  ;;  %v1092_v57 = vpop.xlane.xlu1 %1091 }
 0x4dd   : > { %1149 = vst.msk [vmem:[%s2067_s28 + $0x20] sm:$0xff] %vm239_vm1, %v1133_v54  ;;  %v1110_v58 = vmul.f32 0.6931472, %v1760_v56  ;;  %1769 = vlog2.f32 %v1092_v57  ;;  %v1090_v59 = vpop.xlane.xlu0 %1089 }
 0x4de   : > { %v1136_v61 = vsub.f32 %v2030_v37, %v1112_v25  ;;  %1771 = vlog2.f32 %v1090_v59 }
 0x4df   : > { %v1762_v30 = vpop.eup %1761  ;;  %v1135_v62 = vsub.f32 %v2027_v33, %v1110_v58 }
 0x4e0   : > { %v1764_v27 = vpop.eup %1763  ;;  %1152 = vst.msk [vmem:[%s2067_s28 + $0x38] sm:$0xff] %vm239_vm1, %v1136_v61  ;;  %v1116_v0 = vmul.f32 0.6931472, %v1762_v30  ;;  %v1096_v1 = vpop.xlane.xlu1 %1095 }
 0x4e1   : > { %1151 = vst.msk [vmem:[%s2067_s28 + $0x30] sm:$0xff] %vm239_vm1, %v1135_v62  ;;  %v1114_v2 = vmul.f32 0.6931472, %v1764_v27  ;;  %1773 = vlog2.f32 %v1096_v1  ;;  %v1094_v3 = vpop.xlane.xlu0 %1093 }
 0x4e2   : > { %v1138_v37 = vsub.f32 %v2036_v45, %v1116_v0  ;;  %1775 = vlog2.f32 %v1094_v3 }
 0x4e3   : > { %v1766_v5 = vpop.eup %1765  ;;  %v1137_v6 = vsub.f32 %v2033_v40, %v1114_v2 }
 0x4e4   : > { %v1768_v33 = vpop.eup %1767  ;;  %1154 = vst.msk [vmem:[%s2067_s28 + $0x48] sm:$0xff] %vm239_vm1, %v1138_v37  ;;  %v1120_v7 = vmul.f32 0.6931472, %v1766_v5 }
 0x4e5   : > { %1153 = vst.msk [vmem:[%s2067_s28 + $0x40] sm:$0xff] %vm239_vm1, %v1137_v6  ;;  %v1118_v8 = vmul.f32 0.6931472, %v1768_v33 }
 0x4e6   : > { %v1140_v9 = vsub.f32 %v2042_v52, %v1120_v7 }
 0x4e7   : > { %v1770_v10 = vpop.eup %1769  ;;  %v1139_v11 = vsub.f32 %v2039_v48, %v1118_v8 }
 0x4e8   : > { %v1772_v45 = vpop.eup %1771  ;;  %1156 = vst.msk [vmem:[%s2067_s28 + $0x58] sm:$0xff] %vm239_vm1, %v1140_v9  ;;  %v1124_v40 = vmul.f32 0.6931472, %v1770_v10 }
 0x4e9   : > { %1155 = vst.msk [vmem:[%s2067_s28 + $0x50] sm:$0xff] %vm239_vm1, %v1139_v11  ;;  %v1122_v12 = vmul.f32 0.6931472, %v1772_v45 }
 0x4ea   : > { %v1142_v13 = vsub.f32 %v2050_v60, %v1124_v40 }
 0x4eb   : > { %v1774_v14 = vpop.eup %1773  ;;  %v1141_v15 = vsub.f32 %v2046_v55, %v1122_v12 }
 0x4ec   : > { %v1776_v17 = vpop.eup %1775  ;;  %1158 = vst.msk [vmem:[%s2067_s28 + $0x68] sm:$0xff] %vm239_vm1, %v1142_v13  ;;  %v1128_v52 = vmul.f32 0.6931472, %v1774_v14 }
 0x4ed   : > { %1157 = vst.msk [vmem:[%s2067_s28 + $0x60] sm:$0xff] %vm239_vm1, %v1141_v15  ;;  %v1126_v48 = vmul.f32 0.6931472, %v1776_v17 }
 0x4ee   : > { %v1144_v18 = vsub.f32 %v2058_v4, %v1128_v52 }
 0x4ef   : > { %v1143_v19 = vsub.f32 %v2054_v63, %v1126_v48 }
 0x4f0   : > { %1160 = vst.msk [vmem:[%s2067_s28 + $0x78] sm:$0xff] %vm239_vm1, %v1144_v18 }
 0x4f1   : > { %1159 = vst.msk [vmem:[%s2067_s28 + $0x70] sm:$0xff] %vm239_vm1, %v1143_v19 }
 0x4f2 PF: > { %s15_s15 = sadd.s32 1, %s1815_s15  }
 0x4f3   : > { %p12_p3 = scmp.ge.s32.totalorder %s15_s15, 4  }
 0x4f5   :  { %14 = sbr.rel (!%p12_p3) target bundleno = 1 (0x1), region = 73 }
 0x4fc   :  { %1183 = vsyncpa [#allocation3], 1 }
 0x4fd   :  { %1185 = vsyncpa [#allocation3 + $0x1], 1 }

</bundles_post_ra>
